<compile_context>
chip_gen: v6e
topology: v6e:2x2x1
jax: 0.10.0
libtpu: 0.0.40
codegen_flags: <defaults>
</compile_context>

<pallas_src>
import math

import jax
import jax.numpy as jnp
import numpy as np
from jax.experimental import pallas as pl
from jax.experimental.pallas import tpu as pltpu


def _round_up(n, m):
    return ((n + m - 1) // m) * m


def _lcm(a, b):
    return a * b // math.gcd(a, b)


def _make_kernel(A, AA):
    """Kernel for one batch tile of row-folded input.

    x_ref:     (tbf, fold * D)     f32  `fold` logical rows packed per row
    sel_ref:   (fold * D, fold*AA) f32  constant 0/1 block-diag scatter matrix
    scale_ref: (tbf, fold * AA)    f32  `fold` flattened (A, A) matrices per row
    """

    def kernel(x_ref, sel_ref, scale_ref):
        # 0/1 matmul scatters packed tril values into the flattened (A, A)
        # matrices; loc columns hit all-zero selection rows and vanish.
        dense = jnp.dot(x_ref[...], sel_ref[...],
                        preferred_element_type=jnp.float32)
        # Diagonal mask over the dense output: flat index m within one AA
        # block satisfies m % (A + 1) == 0 exactly at (i, i).
        col = jax.lax.broadcasted_iota(jnp.int32, dense.shape, 1)
        is_diag = (col % AA) % (A + 1) == 0
        scale_ref[...] = jnp.where(is_diag, jnp.exp(dense), dense)

    return kernel


def full_cov_normal_param_extractor(x, action_dim, *, batch_tile=16384):
    """JAX/Pallas equivalent of FullCovarianceNormalParamExtractor.forward."""
    A = int(action_dim)
    T = A * (A + 1) // 2
    AA = A * A
    D = A + T
    x = jnp.asarray(x, jnp.float32)
    B, Din = x.shape
    assert Din == D, "input width must be A + A*(A+1)/2"

    # loc: trivial wrapper slice (no kernel output for it).
    loc = x[:, :A]

    # ---- row folding so the kernel output block is lane-dense (128 mult) ----
    fold = _lcm(AA, 128) // AA          # smallest fold with fold*AA % 128 == 0
    if fold > 32:
        # Keep the block-diagonal contraction small (stay HBM-bound).
        # TODO(synk): for such A, pad the flat output width to 128 instead.
        fold = 8
    # Keep the HBM reshape a pure bitcast (no padding / slicing copies).
    fold = max(1, math.gcd(fold, B))

    Bf = B // fold                      # physical rows seen by the kernel
    Kin = fold * D
    Kout = fold * AA
    x_f = x.reshape(Bf, Kin)            # free row-major reshape

    # ---- tile sizing ---------------------------------------------------------
    tbf = max(1, int(batch_tile) // fold)
    tbf = min(tbf, 4096)                # cap double-buffered working set
    if Bf <= 8:
        tbf = Bf                        # single tiny block (== full dim: legal)
        num_tiles = 1
    else:
        tbf = _round_up(min(tbf, Bf), 8)
        if pl.cdiv(Bf, tbf) < 2:        # v7x megacore: give both TCs grid work
            tbf = _round_up(pl.cdiv(Bf, 2), 8)
        num_tiles = pl.cdiv(Bf, tbf)    # last tile may overhang -> masked store

    # ---- constant 0/1 block-diagonal scatter matrix (f32, VMEM-resident) ----
    rows, cols = np.tril_indices(A)     # same order as torch.tril_indices
    sel_np = np.zeros((Kin, Kout), dtype=np.float32)
    for f in range(fold):
        sel_np[f * D + A + np.arange(T), f * AA + rows * A + cols] = 1.0
    sel = jnp.asarray(sel_np)

    block_bytes = tbf * (Kin + Kout) * 4
    vmem_limit = int(min(64 << 20,
                         max(2 * block_bytes + sel.size * 4 + (2 << 20),
                             16 << 20)))

    cost = pl.CostEstimate(
        flops=2 * Bf * Kin * Kout,
        transcendentals=Bf * Kout,
        bytes_accessed=Bf * (Kin + Kout) * 4 + sel.size * 4,
    )

    scale_flat = pl.pallas_call(
        _make_kernel(A, AA),
        out_shape=jax.ShapeDtypeStruct((Bf, Kout), jnp.float32),
        grid=(num_tiles,),
        in_specs=[
            pl.BlockSpec((tbf, Kin), lambda i: (i, 0)),    # x (row-folded)
            pl.BlockSpec((Kin, Kout), lambda i: (0, 0)),   # constant scatter
        ],
        out_specs=pl.BlockSpec((tbf, Kout), lambda i: (i, 0)),
        compiler_params=pltpu.CompilerParams(
            dimension_semantics=("parallel",),
            vmem_limit_bytes=vmem_limit),
        cost_estimate=cost,
    )(x_f, sel)

    scale_tril = scale_flat.reshape(B, A, A)   # free row-major reshape back
    # TODO(synk): TensorDict has no JAX equivalent; returning a plain dict.
    return {"loc": loc, "scale_tril": scale_tril}


def _reference(x, action_dim):
    """Pure numpy reference mirroring the PyTorch forward."""
    x = np.asarray(x)
    B = x.shape[0]
    A = action_dim
    loc = x[:, :A]
    scale = np.zeros((B, A, A), dtype=np.float32)
    rows, cols = np.tril_indices(A)
    scale[:, rows, cols] = x[:, A:]
    d = np.arange(A)
    scale[:, d, d] = np.exp(scale[:, d, d])
    return loc, scale


if __name__ == "__main__":
    action_dim = 4
    B = 200                          # multi-tile grid + overhanging last tile
    D = action_dim + action_dim * (action_dim + 1) // 2   # 4 + 10 = 14

    key = jax.random.PRNGKey(0)
    x = jax.random.normal(key, (B, D), dtype=jnp.float32)

    out = full_cov_normal_param_extractor(x, action_dim, batch_tile=128)
    loc = jax.block_until_ready(out["loc"])
    scale_tril = jax.block_until_ready(out["scale_tril"])

    ref_loc, ref_scale = _reference(x, action_dim)
    np.testing.assert_allclose(np.asarray(loc), ref_loc, rtol=1e-6, atol=1e-6)
    np.testing.assert_allclose(np.asarray(scale_tril), ref_scale,
                               rtol=1e-5, atol=1e-5)

    assert loc.shape == (B, action_dim)
    assert scale_tril.shape == (B, action_dim, action_dim)
    print("KERNEL_OK")
</pallas_src>

<mosaic_0001>
module attributes {stable_mosaic.version = 11 : i64} {
  func.func @kernel(%arg0: i32, %arg1: memref<16x112xf32, #tpu.memory_space<vmem>>, %arg2: memref<112x128xf32, #tpu.memory_space<vmem>>, %arg3: memref<16x128xf32, #tpu.memory_space<vmem>>) attributes {dimension_semantics = [#tpu.dimension_semantics<parallel>], iteration_bounds = array<i64: 2>, scalar_prefetch = 0 : i64, scratch_operands = 0 : i64, tpu.core_type = #tpu.core_type<tc>, window_params = [{transform_indices = @transform_0, window_bounds = array<i64: 16, 112>}, {pipeline_mode = #tpu.pipeline_mode<synchronous>, transform_indices = @transform_1, window_bounds = array<i64: 112, 128>}, {transform_indices = @transform_2, window_bounds = array<i64: 16, 128>}]} {
    %c0 = arith.constant 0 : index
    %c0_0 = arith.constant 0 : index
    %0 = vector.load %arg1[%c0, %c0_0] : memref<16x112xf32, #tpu.memory_space<vmem>>, vector<16x112xf32>
    %c0_1 = arith.constant 0 : index
    %c0_2 = arith.constant 0 : index
    %1 = vector.load %arg2[%c0_1, %c0_2] : memref<112x128xf32, #tpu.memory_space<vmem>>, vector<112x128xf32>
    %cst = arith.constant dense<0.000000e+00> : vector<16x128xf32>
    %2 = tpu.matmul %0, %1, %cst {dimension_numbers = #tpu.dot_dimension_numbers<[1], [0], [0], [1], [0, 0, 1, 1], [], []>} : vector<16x112xf32>, vector<112x128xf32>, vector<16x128xf32> -> vector<16x128xf32>
    %3 = tpu.iota {dimensions = array<i32: 1>} : vector<16x128xi32>
    %c16_i32 = arith.constant 16 : i32
    %c0_i32 = arith.constant 0 : i32
    %4 = arith.cmpi eq, %c16_i32, %c0_i32 : i32
    %c1_i32 = arith.constant 1 : i32
    %5 = arith.select %4, %c1_i32, %c16_i32 : i32
    %6 = vector.broadcast %5 : i32 to vector<16x128xi32>
    %7 = arith.remsi %3, %6 : vector<16x128xi32>
    %c0_i32_3 = arith.constant 0 : i32
    %8 = vector.broadcast %c0_i32_3 : i32 to vector<16x128xi32>
    %9 = arith.cmpi ne, %7, %8 : vector<16x128xi32>
    %c0_i32_4 = arith.constant 0 : i32
    %10 = vector.broadcast %c0_i32_4 : i32 to vector<16x128xi32>
    %11 = arith.cmpi slt, %7, %10 : vector<16x128xi32>
    %c0_i32_5 = arith.constant 0 : i32
    %12 = arith.cmpi slt, %5, %c0_i32_5 : i32
    %13 = vector.broadcast %12 : i1 to vector<16x128xi1>
    %14 = vector.broadcast %13 : vector<16x128xi1> to vector<16x128xi1>
    %15 = arith.xori %11, %14 : vector<16x128xi1>
    %16 = arith.andi %15, %9 : vector<16x128xi1>
    %17 = vector.broadcast %5 : i32 to vector<16x128xi32>
    %18 = arith.addi %7, %17 : vector<16x128xi32>
    %19 = arith.select %16, %18, %7 : vector<16x128xi1>, vector<16x128xi32>
    %c5_i32 = arith.constant 5 : i32
    %c0_i32_6 = arith.constant 0 : i32
    %20 = arith.cmpi eq, %c5_i32, %c0_i32_6 : i32
    %c1_i32_7 = arith.constant 1 : i32
    %21 = arith.select %20, %c1_i32_7, %c5_i32 : i32
    %22 = vector.broadcast %21 : i32 to vector<16x128xi32>
    %23 = arith.remsi %19, %22 : vector<16x128xi32>
    %c0_i32_8 = arith.constant 0 : i32
    %24 = vector.broadcast %c0_i32_8 : i32 to vector<16x128xi32>
    %25 = arith.cmpi ne, %23, %24 : vector<16x128xi32>
    %c0_i32_9 = arith.constant 0 : i32
    %26 = vector.broadcast %c0_i32_9 : i32 to vector<16x128xi32>
    %27 = arith.cmpi slt, %23, %26 : vector<16x128xi32>
    %c0_i32_10 = arith.constant 0 : i32
    %28 = arith.cmpi slt, %21, %c0_i32_10 : i32
    %29 = vector.broadcast %28 : i1 to vector<16x128xi1>
    %30 = vector.broadcast %29 : vector<16x128xi1> to vector<16x128xi1>
    %31 = arith.xori %27, %30 : vector<16x128xi1>
    %32 = arith.andi %31, %25 : vector<16x128xi1>
    %33 = vector.broadcast %21 : i32 to vector<16x128xi32>
    %34 = arith.addi %23, %33 : vector<16x128xi32>
    %35 = arith.select %32, %34, %23 : vector<16x128xi1>, vector<16x128xi32>
    %c0_i32_11 = arith.constant 0 : i32
    %36 = vector.broadcast %c0_i32_11 : i32 to vector<16x128xi32>
    %37 = arith.cmpi eq, %35, %36 : vector<16x128xi32>
    %38 = math.exp %2 : vector<16x128xf32>
    %39 = arith.select %37, %38, %2 : vector<16x128xi1>, vector<16x128xf32>
    %c0_12 = arith.constant 0 : index
    %c0_13 = arith.constant 0 : index
    %40 = vector.load %arg3[%c0_12, %c0_13] : memref<16x128xf32, #tpu.memory_space<vmem>>, vector<16x128xf32>
    tpu.vector_store %arg3[%c0_12, %c0_13], %39 {strides = array<i32>} : memref<16x128xf32, #tpu.memory_space<vmem>>, vector<16x128xf32>,
    return
  }
  func.func @transform_0(%arg0: i32) -> (i32, i32) {
    %c0_i32 = arith.constant 0 : i32
    %c0_i32_0 = arith.constant 0 : i32
    return %arg0, %c0_i32 : i32, i32
  }
  func.func @transform_1(%arg0: i32) -> (i32, i32) {
    %c0_i32 = arith.constant 0 : i32
    %c0_i32_0 = arith.constant 0 : i32
    %c0_i32_1 = arith.constant 0 : i32
    return %c0_i32, %c0_i32_0 : i32, i32
  }
  func.func @transform_2(%arg0: i32) -> (i32, i32) {
    %c0_i32 = arith.constant 0 : i32
    %c0_i32_0 = arith.constant 0 : i32
    return %arg0, %c0_i32 : i32, i32
  }
}

</mosaic_0001>

<bundles_post_ra>
// kernel: tpu_custom_call.1
= control target key start
LH: loop header
LB: loop body
LE: loop exit
PB: predicated region body
PF: predicated region fallthrough
CT: control target
= control target key end

     0   :  { %7 = vsyncpa [#allocation3], 0  ;;  %s890_s0 = inlined_call_operand.hbm [shape: f32[25,112], index: 0, kind: input, shape index: {}]   ;;  %s891_s1 = inlined_call_operand.hbm [shape: f32[112,128], index: 1, kind: input, shape index: {}]   ;;  %s892_s2 = inlined_call_operand.hbm [shape: f32[25,128], index: 2, kind: output, shape index: {}]  }
   0x1   :  { %9 = vsyncpa [#allocation3 + $0x1], 0 }
   0x2   :  { %10 = vsyncpa [#allocation6], 0 }
   0x3   :  { %11 = vsyncpa [#allocation4], 0 }
   0x4   :  { %13 = vsyncpa [#allocation4 + $0x1], 0  ;;  %s693_s9 = smov 0   ;;  %s695_s10 = smov 0  }
   0x5   :  { %s697_s11 = smov 0   ;;  %s699_s12 = smov 0  }
   0x6 LB: > { %s714_s13 = sadd.s32 4294967295, %s669_s12   ;;  %s413_s14 = sadd.s32 4294967294, %s669_s12   ;;  %s669_s12 = sphi %s699_s12, %s914_s12   ;;  %s665_s11 = sphi %s697_s11, %s913_s11   ;;  %s661_s10 = sphi %s695_s10, %s912_s10   ;;  %s657_s9 = sphi %s693_s9, %s911_s9  }
   0x7   : > { %p39_p0 = scmp.ne.s32.totalorder %s661_s10, %s657_s9  ;;  %p893_p1 = scmp.eq.s32.totalorder %s714_s13, 0 }
   0x8   : > { %p90_p3 = scmp.eq.s32.totalorder %s413_s14, 1  ;;  %p414_p5 = scmp.ge.s32.totalorder %s669_s12, 1 }
   0x9   : > { %p723_p4 = por %p893_p1, %p39_p0  ;;  %p97_p7 = scmp.lt.s32.totalorder %s669_s12, 3 }
   0xa   : > { %p728_p6 = por %p90_p3, %p39_p0  ;;  %s671_s18 = smov [#allocation5]  }
   0xb   : > { %s897_s15 = scalar_select %p723_p4, 1, 0 }
   0xc   : > { %s898_s16 = scalar_select %p728_p6, 1, 0 }
   0xd   : > { %p733_p8 = pnand %p414_p5, %p97_p7  ;;  %s109_s19 = sshll.u32 %s671_s18, 4  ;;  %s110_s19 = int_to_ptr.vmem [resolvable:$true] %s109_s19 }
   0xe   : > { %s747_s21 = sadd.s32 1, %s669_s12   ;;  %s26_s22 = sadd.s32 1, %s665_s11 }
   0xf   : > { %s899_s17 = scalar_select %p733_p8, 1, 0 }
  0x10   : > { %p490_p9 = pneg %p733_p8  ;;  %s23_s23 = ssub.s32 %s669_s12, %s747_s21 }
  0x11   : > { %s558_s24 = scalar_lea.vmem %s110_s19, 1792  ;;  %p566_p5 = scmp.lt.s32.totalorder %s110_s19, %s110_s19 }
  0x12   : > { %p742_p11 = pnand %p490_p9, %p893_p1  ;;  %p559_p13 = scmp.ne.s32.totalorder %s110_s19, %s558_s24 }
  0x13   : > { %p567_p7 = scmp.lt.s32.totalorder %s558_s24, %s558_s24 }
  0x14   : > { %p549_p12 = pneg %p742_p11 }
  0x15   : > { %p568_p10 = por %p567_p7, %p566_p5 }
  0x16   : > { %p561_p0 = pnand %p559_p13, %p549_p12 }
  0x18   : > { %p562_p3 = pneg %p561_p0 }
  0x1a   : > { %p569_p2 = pnand %p568_p10, %p562_p3 }
  0x1c   : > { %572 = shalt.err (!%p569_p2)
}
  0x1d   : > { %s672_s25 = smov 128   ;;  %s673_s26 = smov 8  }
  0x1e   : > { %493 = dma.hbm_to_vmem [thread:$0]  (!%p742_p11), %s891_s1, 1792, %s110_s19, [#allocation6], %s672_s25, %s672_s25, %s673_s26  }
  0x1f   : > { %p24_p2 = scmp.eq.s32.totalorder %s23_s23, 0  ;;  %p33_p9 = scmp.ne.s32.totalorder %s665_s11, %s661_s10 }
  0x20   : > { %p34_p10 = scmp.eq.s32.totalorder %s669_s12, 0  ;;  %p503_p12 = scmp.lt.s32.totalorder %s669_s12, 2 }
  0x21   : > { %s767_s29 = scalar_select %p24_p2, %s665_s11, %s26_s22  }
  0x22   : > { %p35_p13 = por %p34_p10, %p33_p9  ;;  %p901_p0 = scmp.eq.s32.totalorder %s714_s13, 1 }
  0x23   : > { %s123_s3 = sand.u32 1, %s665_s11   ;;  %s431_s4 = sshll.u32 %s669_s12, 8 }
  0x24   : > { %p771_p3 = por %p901_p0, %p33_p9  ;;  %s417_s5 = sshll.u32 %s123_s3, 4 }
  0x25   : > { %s780_s8 = scalar_lea.hbm %s890_s0, %s431_s4  ;;  %s127_s14 = scalar_lea.vmem [#allocation2], %s417_s5 }
  0x26   : > { %s902_s30 = scalar_select %p771_p3, 1, 0 }
  0x27   : > { %s134_s18 = sshll.u32 %s127_s14, 4  ;;  %p782_p11 = pnand %p503_p12, %p35_p13  ;;  %s786_s18 = int_to_ptr.vmem [resolvable:$true] %s134_s18 }
  0x28   : > { %s788_s20 = scalar_lea.sflag [#allocation3], %s123_s3  ;;  %s573_s22 = scalar_lea.hbm %s780_s8, 256 }
  0x29   : > { %p574_p5 = scmp.ne.s32.totalorder %s780_s8, %s573_s22  ;;  %p575_p7 = pneg %p782_p11 }
  0x2a   : > { %s578_s27 = scalar_lea.hbm %s890_s0, 512  ;;  %p579_p10 = scmp.lt.s32.totalorder %s780_s8, %s890_s0 }
  0x2b   : > { %p576_p2 = pnand %p575_p7, %p574_p5  ;;  %p580_p12 = scmp.lt.s32.totalorder %s578_s27, %s573_s22 }
  0x2d   : > { %p577_p9 = pneg %p576_p2  ;;  %p581_p13 = por %p580_p12, %p579_p10 }
  0x2f   : > { %p582_p0 = pnand %p581_p13, %p577_p9 }
  0x31   : > { %585 = shalt.err (!%p582_p0)
}
  0x32   : > { %s586_s3 = scalar_lea.vmem %s786_s18, 256  ;;  %s674_s5 = smov [#allocation2]  }
  0x33   : > { %p587_p1 = scmp.ne.s32.totalorder %s786_s18, %s586_s3  ;;  %s591_s6 = sshll.u32 %s674_s5, 4  ;;  %s592_s6 = int_to_ptr.vmem [resolvable:$false] %s591_s6 }
  0x34   : > { %s593_s7 = scalar_lea.vmem %s592_s6, 512  ;;  %p594_p2 = scmp.lt.s32.totalorder %s786_s18, %s592_s6 }
  0x35   : > { %p589_p6 = pnand %p587_p1, %p575_p7  ;;  %p595_p3 = scmp.lt.s32.totalorder %s593_s7, %s586_s3 }
  0x37   : > { %p590_p5 = pneg %p589_p6  ;;  %p596_p4 = por %p595_p3, %p594_p2 }
  0x39   : > { %p597_p8 = pnand %p596_p4, %p590_p5 }
  0x3b   : > { %600 = shalt.err (!%p597_p8)
}
  0x3c   : > { %497 = dma.hbm_to_vmem [thread:$0]  (!%p782_p11), %s780_s8, 256, %s786_s18, %s788_s20, %s672_s25, %s672_s25, %s673_s26  }
  0x3d   : > { %p904_p1 = scmp.ne.s32.totalorder %s899_s17, 0 }
  0x3e   : > { %s815_s14 = sand.u32 (!%p904_p1), 1, %s661_s10   ;;  %p905_p4 = scmp.ne.s32.totalorder (!%p904_p1), %s897_s15, 0 }
  0x3f   : > { %146 = sbr.rel (%p904_p1) target bundleno = 327 (0x147), region = 28  ;;  %s421_s22 = sshll.u32 (!%p904_p1), %s815_s14, 4 }
  0x40   : > { %s149_s23 = scalar_lea.sflag (!%p904_p1), [#allocation3], %s815_s14  ;;  %s821_s19 = scalar_lea.vmem (!%p904_p1), [#allocation2], %s421_s22 }
  0x44   : > { %644 = dma.done.wait (%p905_p4), %s149_s23, 256  }
  0x45   : > { %646 = vsyncadd (%p905_p4), %s149_s23, 4294967040  ;;  %p906_p6 = scmp.eq.s32.totalorder %s714_s13, 0 }
  0x47   : > { %648 = dma.done.wait (%p906_p6), [#allocation6], 1792   ;;  %p907_p8 = pmov %p906_p6 }
  0x48   : > { %v194_v0 = vld [vmem:[#allocation5 + $0x68] sm:$0xff]  ;;  %v193_v1 = vld [vmem:[#allocation5 + $0x60] sm:$0xff]  ;;  %v192_v2 = vld [vmem:[#allocation5 + $0x58] sm:$0xff]  ;;  %vm195_vm0 = vcmask 916480   ;;  %v277_v16 = vlaneseq  ;;  %s176_s15 = scalar_lea.vmem [#allocation7], %s421_s22  ;;  %s432_s25 = sshll.u32 %s714_s13, 8 }
  0x49   : > { %650 = vsyncadd (%p907_p8), [#allocation6], 4294965504  ;;  %449 = vmatprep.subr.mxu0 %v194_v0  ;;  %v191_v3 = vld [vmem:[#allocation5 + $0x50] sm:$0xff]  ;;  %v190_v5 = vld [vmem:[#allocation5 + $0x48] sm:$0xff]  ;;  %s330_s17 = sshll.u32 %s176_s15, 4  ;;  %s847_s18 = scalar_lea.hbm %s892_s2, %s432_s25  ;;  %s842_s17 = int_to_ptr.vmem [resolvable:$true] %s330_s17 }
  0x4a   : > { %450 = vmatpush3.msra.mxu0 %v194_v0  ;;  %v179_v4 = vld [vmem:[%s821_s19] sm:$0xff]  ;;  %v188_v7 = vld [vmem:[#allocation5 + $0x38] sm:$0xff]  ;;  %v186_v9 = vld [vmem:[#allocation5 + $0x28] sm:$0xff]  ;;  %v278_v17 = vand.u32 127, %v277_v16  ;;  %s317_s20 = scalar_lea.sflag [#allocation4], %s815_s14  ;;  %s601_s24 = scalar_lea.vmem %s842_s17, 256 }
  0x4b   : > { %451 = vmatprep.subr.mxu0 %v193_v1  ;;  %477 = vmatprep.mubr.msk.f32.mxu0 %vm195_vm0, %v179_v4  ;;  %v189_v6 = vld [vmem:[#allocation5 + $0x40] sm:$0xff]  ;;  %v187_v8 = vld [vmem:[#allocation5 + $0x30] sm:$0xff]  ;;  %v184_v11 = vld [vmem:[#allocation5 + $0x18] sm:$0xff]  ;;  %p602_p3 = scmp.ne.s32.totalorder %s842_s17, %s601_s24  ;;  %p908_p11 = scmp.ne.s32.totalorder %s902_s30, 0 }
  0x4c   : > { %452 = vmatpush3.msra.mxu0 %v193_v1  ;;  %v185_v10 = vld [vmem:[#allocation5 + $0x20] sm:$0xff]  ;;  %v183_v12 = vld [vmem:[#allocation5 + $0x10] sm:$0xff]  ;;  %v182_v13 = vld [vmem:[#allocation5 + $0x8] sm:$0xff]  ;;  %v283_v18 = vand.u32 15, %v278_v17  ;;  %s675_s13 = smov [#allocation7]  }
  0x4d   : > { %453 = vmatprep.subr.mxu0 %v192_v2  ;;  %v181_v14 = vld [vmem:[#allocation5] sm:$0xff]  ;;  %v180_v15 = vld [vmem:[%s821_s19 + $0x8] sm:$0xff]  ;;  %p603_p7 = pnand %p602_p3, %p908_p11  ;;  %s605_s27 = sshll.u32 %s675_s13, 4  ;;  %s606_s27 = int_to_ptr.vmem [resolvable:$false] %s605_s27 }
  0x4e   : > { %454 = vmatpush3.msra.mxu0 %v192_v2  ;;  %v835_v19 = vmul.u32.u64.low 3435973837, %v283_v18  ;;  %v836_v20 = vmul.u32.u64.high 3435973837, %v283_v18, %v835_v19  ;;  %s607_s28 = scalar_lea.vmem %s606_s27, 512  ;;  %p608_p10 = scmp.lt.s32.totalorder %s842_s17, %s606_s27 }
  0x4f   : > { %455 = vmatprep.subr.mxu0 %v191_v3  ;;  %p604_p9 = pneg %p603_p7  ;;  %p609_p12 = scmp.lt.s32.totalorder %s607_s28, %s601_s24 }
  0x50   : > { %456 = vmatpush3.msra.mxu0 %v191_v3  ;;  %v297_v21 = vshrl.u32 %v836_v20, 2 }
  0x51   : > { %457 = vmatprep.subr.mxu0 %v190_v5  ;;  %p610_p13 = por %p609_p12, %p608_p10 }
  0x52   : > { %458 = vmatpush3.msra.mxu0 %v190_v5  ;;  %v298_v22 = vmul.u32 5, %v297_v21 }
  0x53   : > { %459 = vmatprep.subr.mxu0 %v189_v6  ;;  %p611_p0 = pnand %p610_p13, %p604_p9 }
  0x54   : > { %460 = vmatpush3.msra.mxu0 %v189_v6  ;;  %v299_v24 = vsub.s32 %v283_v18, %v298_v22 }
  0x55   : > { %461 = vmatprep.subr.mxu0 %v188_v7 }
  0x56   : > { %462 = vmatpush3.msra.mxu0 %v188_v7  ;;  %vm302_vm1 = vcmp.ne.s32.totalorder %v299_v24, 0  ;;  %vm303_vm2 = vcmp.lt.s32.totalorder %v299_v24, 0  ;;  %v305_v28 = vadd.s32 5, %v299_v24 }
  0x57   : > { %463 = vmatprep.subr.mxu0 %v187_v8  ;;  %vm304_vm3 = vmand %vm303_vm2, %vm302_vm1 }
  0x58   : > { %464 = vmatpush3.msra.mxu0 %v187_v8  ;;  %v306_v29 = vsel %vm304_vm3, %v305_v28, %v299_v24 }
  0x59   : > { %465 = vmatprep.subr.mxu0 %v186_v9  ;;  %vm307_vm4 = vcmp.eq.s32.totalorder %v306_v29, 0 }
  0x5a   : > { %466 = vmatpush3.msra.mxu0 %v186_v9 }
  0x5b   : > { %467 = vmatprep.subr.mxu0 %v185_v10 }
  0x5c   : > { %468 = vmatpush3.msra.mxu0 %v185_v10 }
  0x5d   : > { %469 = vmatprep.subr.mxu0 %v184_v11 }
  0x5e   : > { %470 = vmatpush3.msra.mxu0 %v184_v11 }
  0x5f   : > { %471 = vmatprep.subr.mxu0 %v183_v12 }
  0x60   : > { %472 = vmatpush3.msra.mxu0 %v183_v12 }
  0x61   : > { %473 = vmatprep.subr.mxu0 %v182_v13 }
  0x62   : > { %474 = vmatpush3.msra.mxu0 %v182_v13 }
  0x63   : > { %475 = vmatprep.subr.mxu0 %v181_v14 }
  0x64   : > { %476 = vmatpush3.msra.mxu0 %v181_v14 }
  0x65   : > { %478 = vmatmul.mubr.msk.f32.vlgmr.msra.gmra.mxu0 %vm195_vm0, %v180_v15 }
 0x125   : > { %v479_v23 = vpop.f32.mrf.mxu0 }
 0x126   : > { %v310_v25 = vmul.f32 1.442695, %v479_v23 }
 0x127   : > { %v268_v26 = vpop.f32.mrf.mxu0 }
 0x128   : > { %543 = vpow2.f32 %v310_v25  ;;  %v308_v27 = vmul.f32 1.442695, %v268_v26 }
 0x12a   : > { %545 = vpow2.f32 %v308_v27 }
 0x135   : > { %v544_v30 = vpop.eup %543 }
 0x136   : > { %v313_v31 = vsel %vm307_vm4, %v544_v30, %v479_v23 }
 0x137   : > { %v546_v32 = vpop.eup %545  ;;  %315 = vst [vmem:[%s176_s15 + $0x8] sm:$0xff] %v313_v31 }
 0x138   : > { %v312_v33 = vsel %vm307_vm4, %v546_v32, %v268_v26 }
 0x139   : > { %314 = vst [vmem:[%s176_s15] sm:$0xff] %v312_v33 }
 0x13a   : > { %614 = shalt.err (!%p611_p0)
}
 0x13b   : > { %s615_s4 = scalar_lea.hbm %s847_s18, 256  ;;  %s619_s6 = scalar_lea.hbm %s892_s2, 512 }
 0x13c   : > { %p616_p5 = scmp.ne.s32.totalorder %s847_s18, %s615_s4  ;;  %p620_p4 = scmp.lt.s32.totalorder %s847_s18, %s892_s2 }
 0x13d   : > { %p621_p6 = scmp.lt.s32.totalorder %s619_s6, %s615_s4 }
 0x13e   : > { %p617_p2 = pnand %p616_p5, %p908_p11 }
 0x13f   : > { %p622_p8 = por %p621_p6, %p620_p4 }
 0x140   : > { %p618_p1 = pneg %p617_p2 }
 0x142   : > { %p623_p3 = pnand %p622_p8, %p618_p1 }
 0x144   : > { %626 = shalt.err (!%p623_p3)
}
 0x145   : > { %s676_s23 = smov 128   ;;  %s677_s19 = smov 8  }
 0x146   : > { %488 = dma.vmem_to_hbm [thread:$0]  (%p908_p11), %s842_s17, 256, %s847_s18, %s317_s20, %s676_s23, %s676_s23, %s677_s19  }
 0x147 PF: > { %s345_s15 = sand.u32 1, %s657_s9   ;;  %p909_p7 = scmp.ne.s32.totalorder %s898_s16, 0 }
 0x148   : > { %p910_p9 = scmp.ge.s32.totalorder %s669_s12, 2  ;;  %s346_s25 = scalar_lea.sflag [#allocation4], %s345_s15 }
 0x14a   : > { %p499_p10 = pnand %p910_p9, %p909_p7 }
 0x14c   : > { %p500_p12 = pneg %p499_p10 }
 0x14e   : > { %652 = dma.done.wait (%p500_p12), %s346_s25, 256  }
 0x14f   : > { %654 = vsyncadd (%p500_p12), %s346_s25, 4294967040  ;;  %p16_p13 = scmp.ge.s32.totalorder %s747_s21, 4   ;;  %s911_s9 = smov %s661_s10 }
 0x150   : > { %s912_s10 = smov %s665_s11  ;;  %s913_s11 = smov %s767_s29 }
 0x151   : > { %s914_s12 = smov %s747_s21  ;;  %18 = sbr.rel (!%p16_p13) target bundleno = 6 (0x6), region = 77 }
 0x156   :  { %351 = vsyncpa [#allocation3], 1 }
 0x157   :  { %353 = vsyncpa [#allocation3 + $0x1], 1 }
 0x158   :  { %354 = vsyncpa [#allocation6], 1 }
 0x159   :  { %355 = vsyncpa [#allocation4], 1 }
 0x15a   :  { %357 = vsyncpa [#allocation4 + $0x1], 1 }

</bundles_post_ra>
